<compile_context>
chip_gen: v7x
topology: tpu7x:2x2x1
jax: 0.10.0
libtpu: 0.0.40
codegen_flags: <defaults>
</compile_context>

<pallas_src>
import functools

import jax
import jax.numpy as jnp
from jax import lax
from jax.experimental import pallas as pl
from jax.experimental.pallas import tpu as pltpu


def _cdiv(a, b):
    return -(-a // b)


def _round_up(a, b):
    return _cdiv(a, b) * b


def _make_kp_loss_kernel(red_axis, elementwise_dtype):
    """Build the per-tile accumulation kernel.

    logits_ref : (TR, P)  native dtype - spatial logits per (instance, keypoint)
    targets_ref: (TR, 1)  int32        - target bin in [0, P), or -1 if the
                                         keypoint is invisible / a padded row
    out_ref    : (1, 2)   f32 SMEM     - [loss_sum, valid_count] for this partial
    """
    ew = elementwise_dtype

    def kernel(logits_ref, targets_ref, out_ref):
        r = pl.program_id(red_axis)

        @pl.when(r == 0)
        def _():
            out_ref[0, 0] = 0.0
            out_ref[0, 1] = 0.0

        # Cast in-kernel (HBM stays narrow for bf16 heads).
        x = logits_ref[...].astype(ew)                            # (TR, P)
        TR, P = x.shape

        # Numerically-stable log-sum-exp.  `x - row_max` feeds only exp(),
        # so the subtract/exp/sum chain fuses; only `x` stays live for the
        # target gather below.
        row_max = jnp.max(x, axis=-1, keepdims=True)              # (TR, 1)
        sum_exp = jnp.sum(jnp.exp(x - row_max).astype(jnp.float32),
                          axis=-1, keepdims=True)                 # (TR, 1) f32
        lse = row_max.astype(jnp.float32) + jnp.log(sum_exp)      # (TR, 1) f32

        # Gather the target logit from the RAW logits via one-hot compare.
        col_ids = lax.broadcasted_iota(jnp.int32, (1, P), 1)      # (1, P)
        tgt = targets_ref[...]                                    # (TR, 1) int32
        onehot = col_ids == tgt                                   # (TR, P) bool
        tgt_logit = jnp.sum(
            jnp.where(onehot, x, jnp.zeros((), ew)).astype(jnp.float32),
            axis=-1, keepdims=True)                               # (TR, 1) f32

        per_row_ce = lse - tgt_logit                              # (TR, 1) f32

        # tgt < 0 marks invisible keypoints AND garbage rows of the ragged
        # boundary block.  Use where (not multiply) so NaN/inf garbage in the
        # discarded branch cannot poison the sum.
        row_valid = tgt >= 0                                      # (TR, 1) bool
        out_ref[0, 0] += jnp.sum(jnp.where(row_valid, per_row_ce, 0.0))
        out_ref[0, 1] += jnp.sum(jnp.where(row_valid, 1.0, 0.0))

    return kernel


def keypoint_rcnn_head_loss(
    pred_keypoint_logits,        # (N, K, S, S) any float dtype
    gt_heatmap_targets,          # (N, K) int, target bin in [0, S*S)
    gt_valid,                    # (N, K) {0,1}
    *,
    loss_weight=1.0,
    normalize_by_visible_keypoints=True,
    normalizer_per_img=64.0,     # num_keypoints * batch_size_per_image * pos_frac
    num_images=1,
    row_tile=512,                # rows per block (multiple of 8 when tiling)
    num_partials=1,              # 1 on single-TC chips (v5e/v6e); 2 on v7x
    core_parallel=False,         # v7x: shard the partial axis across the 2 TCs
    elementwise_dtype=jnp.float32,  # jnp.bfloat16 for v6e/v7x fast path
):
    N, K, S, S2 = pred_keypoint_logits.shape
    assert S == S2
    R, P = N * K, S * S

    # Native dtype, NOT padded: the boundary row tile is ragged.
    flat_logits = pred_keypoint_logits.reshape(R, P)

    # Fold visibility into the (tiny) targets stream: -1 = invisible.
    targets = jnp.where(
        gt_valid.reshape(R) > 0,
        gt_heatmap_targets.reshape(R).astype(jnp.int32),
        jnp.int32(-1),
    ).reshape(R, 1)

    # Row-tile sizing.  A single full-extent tile is always legal; otherwise
    # use a multiple-of-8 tile and let the last block be ragged.
    if R <= row_tile:
        tile_r = R
    else:
        tile_r = _round_up(min(row_tile, R), 8)

    n_tiles = _cdiv(R, tile_r)
    p_par = max(1, min(num_partials, n_tiles))
    tiles_per_par = _cdiv(n_tiles, p_par)
    r_pad = p_par * tiles_per_par * tile_r

    # Pad ONLY the tiny targets stream with the -1 sentinel so garbage rows of
    # ragged/extra logits blocks are always masked in-kernel.
    if r_pad > R:
        targets = jnp.pad(targets, ((0, r_pad - R), (0, 0)), constant_values=-1)

    if p_par == 1:
        grid = (tiles_per_par,)
        red_axis = 0
        row_map = lambda r: (r, 0)
        out_map = lambda r: (0, 0)
        semantics = (pltpu.ARBITRARY,)
    else:
        grid = (p_par, tiles_per_par)
        red_axis = 1
        row_map = lambda p, r: (p * tiles_per_par + r, 0)
        out_map = lambda p, r: (p, 0)
        lead = pltpu.CORE_PARALLEL if core_parallel else pltpu.PARALLEL
        semantics = (lead, pltpu.ARBITRARY)

    # VMEM budget: double-buffered native-dtype input + ~3 f32 tile temporaries.
    in_bytes = tile_r * P * jnp.dtype(flat_logits.dtype).itemsize
    vmem_est = 2 * in_bytes + 3 * tile_r * P * 4 + (1 << 20)
    vmem_limit = int(min(max(32 << 20, vmem_est), 112 << 20))

    partials = pl.pallas_call(
        _make_kp_loss_kernel(red_axis, elementwise_dtype),
        out_shape=jax.ShapeDtypeStruct((p_par, 2), jnp.float32),
        grid_spec=pltpu.PrefetchScalarGridSpec(
            num_scalar_prefetch=0,
            grid=grid,
            in_specs=[
                pl.BlockSpec((tile_r, P), row_map),
                pl.BlockSpec((tile_r, 1), row_map),
            ],
            out_specs=pl.BlockSpec((1, 2), out_map,
                                   memory_space=pltpu.MemorySpace.SMEM),
        ),
        compiler_params=pltpu.CompilerParams(
            dimension_semantics=semantics,
            vmem_limit_bytes=vmem_limit,
        ),
    )(flat_logits, targets)

    loss_sum = jnp.sum(partials[:, 0])
    valid_cnt = jnp.sum(partials[:, 1])

    if normalize_by_visible_keypoints:
        # Clamp to avoid 0/0 -> NaN (the where below selects 0.0 anyway, but a
        # NaN in the discarded branch would poison gradients).
        normalizer = jnp.maximum(valid_cnt, 1.0)
    else:
        normalizer = jnp.float32(num_images * normalizer_per_img)

    # torch: if there are no visible keypoints, return pred.sum() * 0 == 0.
    loss = jnp.where(valid_cnt > 0.0, loss_sum / normalizer, 0.0)
    return {"loss_keypoint": loss * jnp.float32(loss_weight)}


def _reference_loss(logits, targets, valid, normalize_by_visible, norm_const,
                    loss_weight):
    """Pure-JAX reference for correctness checking."""
    N, K, S, _ = logits.shape
    flat = logits.reshape(N * K, S * S).astype(jnp.float32)
    t = targets.reshape(-1)
    v = valid.reshape(-1).astype(jnp.float32)
    logp = jax.nn.log_softmax(flat, axis=-1)
    ce = -jnp.take_along_axis(logp, t[:, None], axis=-1)[:, 0]
    loss_sum = jnp.sum(ce * v)
    cnt = jnp.sum(v)
    normalizer = jnp.maximum(cnt, 1.0) if normalize_by_visible else jnp.float32(norm_const)
    return jnp.where(cnt > 0, loss_sum / normalizer, 0.0) * loss_weight


if __name__ == "__main__":
    key = jax.random.PRNGKey(0)
    k1, k2, k3 = jax.random.split(key, 3)

    # Config values (cfg.MODEL.ROI_KEYPOINT_HEAD.*): deterministic, in-script.
    LOSS_WEIGHT = 1.0
    NORMALIZE_BY_VISIBLE = True
    BATCH_SIZE_PER_IMAGE = 64
    POSITIVE_FRACTION = 0.25
    NUM_IMAGES = 2

    # --- test 1: small shapes, single full-extent tile --------------------
    N, K, S = 8, 4, 16   # R = 32 rows, P = 256 lanes
    NORMALIZER_PER_IMG = K * BATCH_SIZE_PER_IMAGE * POSITIVE_FRACTION
    x = jax.random.normal(k1, (N, K, S, S), dtype=jnp.float32)
    targets = jax.random.randint(k2, (N, K), 0, S * S, dtype=jnp.int32)
    valid = jax.random.randint(k3, (N, K), 0, 2, dtype=jnp.int32)

    out = keypoint_rcnn_head_loss(
        x, targets, valid,
        loss_weight=LOSS_WEIGHT,
        normalize_by_visible_keypoints=NORMALIZE_BY_VISIBLE,
        normalizer_per_img=NORMALIZER_PER_IMG,
        num_images=NUM_IMAGES,
    )
    loss = jax.block_until_ready(out["loss_keypoint"])
    ref = _reference_loss(x, targets, valid, NORMALIZE_BY_VISIBLE,
                          NUM_IMAGES * NORMALIZER_PER_IMG, LOSS_WEIGHT)
    ref = jax.block_until_ready(ref)
    assert jnp.allclose(loss, ref, rtol=1e-5, atol=1e-5), (loss, ref)

    # --- test 2: ragged boundary tile (R not a multiple of tile_r) --------
    k4, k5, k6 = jax.random.split(jax.random.PRNGKey(1), 3)
    N2, K2 = 5, 3                                 # R = 15 rows, tile_r = 8
    x2 = jax.random.normal(k4, (N2, K2, S, S), dtype=jnp.float32)
    targets2 = jax.random.randint(k5, (N2, K2), 0, S * S, dtype=jnp.int32)
    valid2 = jax.random.randint(k6, (N2, K2), 0, 2, dtype=jnp.int32)

    out2 = keypoint_rcnn_head_loss(
        x2, targets2, valid2,
        loss_weight=LOSS_WEIGHT,
        normalize_by_visible_keypoints=NORMALIZE_BY_VISIBLE,
        normalizer_per_img=K2 * BATCH_SIZE_PER_IMAGE * POSITIVE_FRACTION,
        num_images=NUM_IMAGES,
        row_tile=8,
    )
    loss2 = jax.block_until_ready(out2["loss_keypoint"])
    ref2 = _reference_loss(x2, targets2, valid2, NORMALIZE_BY_VISIBLE,
                           NUM_IMAGES * K2 * BATCH_SIZE_PER_IMAGE * POSITIVE_FRACTION,
                           LOSS_WEIGHT)
    ref2 = jax.block_until_ready(ref2)
    assert jnp.allclose(loss2, ref2, rtol=1e-5, atol=1e-5), (loss2, ref2)

    print("KERNEL_OK")
</pallas_src>

<mosaic_0001>
module attributes {stable_mosaic.version = 11 : i64} {
  func.func @kernel(%arg0: i32, %arg1: memref<32x256xf32, #tpu.memory_space<vmem>>, %arg2: memref<32x1xi32, #tpu.memory_space<vmem>>, %arg3: memref<1x2xf32, #tpu.memory_space<smem>>) attributes {dimension_semantics = [#tpu.dimension_semantics<arbitrary>], iteration_bounds = array<i64: 1>, scalar_prefetch = 0 : i64, scratch_operands = 0 : i64, tpu.core_type = #tpu.core_type<tc>, window_params = [{transform_indices = @transform_0, window_bounds = array<i64: 32, 256>}, {transform_indices = @transform_1, window_bounds = array<i64: 32, 1>}, {transform_indices = @transform_2, window_bounds = array<i64: 1, 2>}]} {
    %c0_i32 = arith.constant 0 : i32
    %0 = arith.cmpi eq, %arg0, %c0_i32 : i32
    %1 = arith.extui %0 : i1 to i32
    %c0_i32_0 = arith.constant 0 : i32
    %2 = arith.cmpi ne, %1, %c0_i32_0 : i32
    scf.if %2 {
      %cst_20 = arith.constant 0.000000e+00 : f32
      %c0_21 = arith.constant 0 : index
      %c0_22 = arith.constant 0 : index
      %44 = memref.load %arg3[%c0_21, %c0_22] : memref<1x2xf32, #tpu.memory_space<smem>>
      memref.store %cst_20, %arg3[%c0_21, %c0_22] : memref<1x2xf32, #tpu.memory_space<smem>>
      %cst_23 = arith.constant 0.000000e+00 : f32
      %c0_24 = arith.constant 0 : index
      %c1_25 = arith.constant 1 : index
      %45 = memref.load %arg3[%c0_24, %c1_25] : memref<1x2xf32, #tpu.memory_space<smem>>
      memref.store %cst_23, %arg3[%c0_24, %c1_25] : memref<1x2xf32, #tpu.memory_space<smem>>
    } else {
    }
    %c0 = arith.constant 0 : index
    %c0_1 = arith.constant 0 : index
    %3 = vector.load %arg1[%c0, %c0_1] : memref<32x256xf32, #tpu.memory_space<vmem>>, vector<32x256xf32>
    %cst = arith.constant dense<0xFF800000> : vector<32xf32>
    %4 = vector.multi_reduction <maximumf>, %3, %cst [1] : vector<32x256xf32> to vector<32xf32>
    %5 = vector.shape_cast %4 : vector<32xf32> to vector<32x1xf32>
    %6 = vector.broadcast %5 : vector<32x1xf32> to vector<32x256xf32>
    %7 = arith.subf %3, %6 : vector<32x256xf32>
    %8 = math.exp %7 : vector<32x256xf32>
    %cst_2 = arith.constant dense<0.000000e+00> : vector<32xf32>
    %9 = vector.multi_reduction <add>, %8, %cst_2 [1] : vector<32x256xf32> to vector<32xf32>
    %10 = vector.shape_cast %9 : vector<32xf32> to vector<32x1xf32>
    %11 = math.log %10 : vector<32x1xf32>
    %12 = arith.addf %5, %11 : vector<32x1xf32>
    %13 = tpu.iota {dimensions = array<i32: 1>} : vector<1x256xi32>
    %c0_3 = arith.constant 0 : index
    %c0_4 = arith.constant 0 : index
    %14 = vector.load %arg2[%c0_3, %c0_4] : memref<32x1xi32, #tpu.memory_space<vmem>>, vector<32x1xi32>
    %15 = vector.broadcast %13 : vector<1x256xi32> to vector<32x256xi32>
    %16 = vector.broadcast %14 : vector<32x1xi32> to vector<32x256xi32>
    %17 = arith.cmpi eq, %15, %16 : vector<32x256xi32>
    %cst_5 = arith.constant 0.000000e+00 : f32
    %18 = vector.broadcast %cst_5 : f32 to vector<32x256xf32>
    %19 = arith.select %17, %3, %18 : vector<32x256xi1>, vector<32x256xf32>
    %cst_6 = arith.constant dense<0.000000e+00> : vector<32xf32>
    %20 = vector.multi_reduction <add>, %19, %cst_6 [1] : vector<32x256xf32> to vector<32xf32>
    %21 = vector.shape_cast %20 : vector<32xf32> to vector<32x1xf32>
    %22 = arith.subf %12, %21 : vector<32x1xf32>
    %c0_i32_7 = arith.constant 0 : i32
    %23 = vector.broadcast %c0_i32_7 : i32 to vector<32x1xi32>
    %24 = arith.cmpi sge, %14, %23 : vector<32x1xi32>
    %c0_8 = arith.constant 0 : index
    %c0_9 = arith.constant 0 : index
    %25 = memref.load %arg3[%c0_8, %c0_9] : memref<1x2xf32, #tpu.memory_space<smem>>
    %cst_10 = arith.constant 0.000000e+00 : f32
    %26 = vector.broadcast %cst_10 : f32 to vector<32x1xf32>
    %27 = arith.select %24, %22, %26 : vector<32x1xi1>, vector<32x1xf32>
    %28 = vector.shape_cast %27 : vector<32x1xf32> to vector<1x32x1xf32>
    %cst_11 = arith.constant dense<0.000000e+00> : vector<1xf32>
    %29 = vector.multi_reduction <add>, %28, %cst_11 [1, 2] : vector<1x32x1xf32> to vector<1xf32>
    %30 = vector.shape_cast %29 : vector<1xf32> to vector<1x1x1xf32>
    %31 = vector.extract %30[0, 0, 0] : f32 from vector<1x1x1xf32>
    %32 = arith.addf %25, %31 : f32
    %c0_12 = arith.constant 0 : index
    %c0_13 = arith.constant 0 : index
    %33 = memref.load %arg3[%c0_12, %c0_13] : memref<1x2xf32, #tpu.memory_space<smem>>
    memref.store %32, %arg3[%c0_12, %c0_13] : memref<1x2xf32, #tpu.memory_space<smem>>
    %c0_14 = arith.constant 0 : index
    %c1 = arith.constant 1 : index
    %34 = memref.load %arg3[%c0_14, %c1] : memref<1x2xf32, #tpu.memory_space<smem>>
    %cst_15 = arith.constant 1.000000e+00 : f32
    %cst_16 = arith.constant 0.000000e+00 : f32
    %35 = vector.broadcast %cst_15 : f32 to vector<32x1xf32>
    %36 = vector.broadcast %cst_16 : f32 to vector<32x1xf32>
    %37 = arith.select %24, %35, %36 : vector<32x1xi1>, vector<32x1xf32>
    %38 = vector.shape_cast %37 : vector<32x1xf32> to vector<1x32x1xf32>
    %cst_17 = arith.constant dense<0.000000e+00> : vector<1xf32>
    %39 = vector.multi_reduction <add>, %38, %cst_17 [1, 2] : vector<1x32x1xf32> to vector<1xf32>
    %40 = vector.shape_cast %39 : vector<1xf32> to vector<1x1x1xf32>
    %41 = vector.extract %40[0, 0, 0] : f32 from vector<1x1x1xf32>
    %42 = arith.addf %34, %41 : f32
    %c0_18 = arith.constant 0 : index
    %c1_19 = arith.constant 1 : index
    %43 = memref.load %arg3[%c0_18, %c1_19] : memref<1x2xf32, #tpu.memory_space<smem>>
    memref.store %42, %arg3[%c0_18, %c1_19] : memref<1x2xf32, #tpu.memory_space<smem>>
    return
  }
  func.func @transform_0(%arg0: i32) -> (i32, i32) {
    %c0_i32 = arith.constant 0 : i32
    %c0_i32_0 = arith.constant 0 : i32
    return %arg0, %c0_i32 : i32, i32
  }
  func.func @transform_1(%arg0: i32) -> (i32, i32) {
    %c0_i32 = arith.constant 0 : i32
    %c0_i32_0 = arith.constant 0 : i32
    return %arg0, %c0_i32 : i32, i32
  }
  func.func @transform_2(%arg0: i32) -> (i32, i32) {
    %c0_i32 = arith.constant 0 : i32
    %c0_i32_0 = arith.constant 0 : i32
    %c0_i32_1 = arith.constant 0 : i32
    return %c0_i32, %c0_i32_0 : i32, i32
  }
}

</mosaic_0001>

<bundles_post_ra>
// kernel: tpu_custom_call.1
= control target key start
LH: loop header
LB: loop body
LE: loop exit
PB: predicated region body
PF: predicated region fallthrough
CT: control target
= control target key end

     0   :  { %7 = vsyncpa [#allocation3], 0  ;;  %s451_s0 = inlined_call_operand.hbm [shape: f32[32,256], index: 0, kind: input, shape index: {}]   ;;  %s452_s1 = inlined_call_operand.vmem [shape: s32[32,1], index: 1, kind: input, shape index: {}]   ;;  %s453_s2 = inlined_call_operand.hbm [shape: f32[1,2], index: 2, kind: output, shape index: {}]  }
   0x1   :  { %8 = vsyncpa [#allocation4], 0  ;;  %s294_s9 = smov [#allocation2]   ;;  %s258_s13 = scalar_lea.hbm %s451_s0, 1024 }
   0x2   :  { %s14_s10 = sshll.u32 %s294_s9, 4  ;;  %p259_p0 = scmp.ne.s32.totalorder %s451_s0, %s258_s13  ;;  %s15_s10 = int_to_ptr.vmem [resolvable:$true] %s14_s10 }
   0x3   :  { %p262_p1 = scmp.lt.u32.totalorder %s258_s13, %s451_s0 }
   0x5   :  { %p264_p2 = pnand %p262_p1, %p259_p0 }
   0x7   :  { %267 = shalt.err (!%p264_p2)
}
   0x8   :  { %s268_s18 = scalar_lea.vmem %s15_s10, 1024  ;;  %p273_p4 = scmp.lt.s32.totalorder %s15_s10, %s15_s10 }
   0x9   :  { %p269_p3 = scmp.ne.s32.totalorder %s15_s10, %s268_s18  ;;  %p274_p5 = scmp.lt.s32.totalorder %s268_s18, %s268_s18 }
   0xb   :  { %p275_p6 = por %p274_p5, %p273_p4 }
   0xd   :  { %p276_p7 = pnand %p275_p6, %p269_p3 }
   0xf   :  { %279 = shalt.err (!%p276_p7)
}
  0x10   :  { %s295_s19 = smov 256   ;;  %s296_s20 = smov 16  }
  0x11   :  { %20 = dma.hbm_to_vmem [thread:$0]  %s451_s0, 1024, %s15_s10, [#allocation3], %s295_s19, %s295_s19, %s296_s20  }
  0x12   :  { %290 = dma.done.wait [#allocation3], 1024  }
  0x13   :  { %291 = vsyncadd [#allocation3], 4294966272  ;;  %v297_v0 = vmov 0   ;;  %v327_v1 = vld [vmem:[#allocation2] sm:$0xff]  ;;  %v329_v2 = vld [vmem:[#allocation2 + $0x8] sm:$0xff]  ;;  %v102_v35 = vlaneseq  ;;  %vm162_vm10 = vcmask 7168  }
  0x14   :  { %233 = vset.pattern.permute.xlu1 %v297_v0  ;;  %232 = vset.pattern.permute.xlu0 %v297_v0  ;;  %v331_v3 = vld [vmem:[#allocation2 + $0x20] sm:$0xff]  ;;  %v42_v4 = vmax.f32 %v327_v1, %v329_v2  ;;  %v335_v5 = vld [vmem:[#allocation2 + $0x28] sm:$0xff]  ;;  %v337_v6 = vld [vmem:[#allocation2 + $0x10] sm:$0xff]  ;;  %s280_s5 = scalar_lea.hbm %s453_s2, 16 }
  0x15   :  { %v339_v7 = vld [vmem:[#allocation2 + $0x18] sm:$0xff]  ;;  %v48_v8 = vmax.f32 %v331_v3, %v335_v5  ;;  %v343_v9 = vld [vmem:[#allocation2 + $0x30] sm:$0xff]  ;;  %v354_v13 = vld [vmem:[%s452_s1 + $0x8] sm:$0xff]  ;;  %v103_v39 = vand.u32 127, %v102_v35  ;;  %p281_p8 = scmp.ne.s32.totalorder %s453_s2, %s280_s5  ;;  %p284_p9 = scmp.lt.u32.totalorder %s280_s5, %s453_s2 }
  0x16   :  { %v345_v10 = vld [vmem:[#allocation2 + $0x38] sm:$0xff]  ;;  %43 = vmax.xlane.f32.xlu0 %v42_v4  ;;  %v45_v11 = vmax.f32 %v337_v6, %v339_v7  ;;  %v360_v14 = vld [vmem:[%s452_s1 + $0x10] sm:$0xff]  ;;  %v365_v15 = vld [vmem:[%s452_s1] sm:$0xff]  ;;  %vm154_vm8 = vcmp.ge.s32.totalorder %v354_v13, 0  ;;  %v298_v4 = vmov 0.0  }
  0x17   :  { %49 = vmax.xlane.f32.xlu1 %v48_v8  ;;  %v51_v12 = vmax.f32 %v343_v9, %v345_v10  ;;  %v372_v16 = vld [vmem:[%s452_s1 + $0x18] sm:$0xff]  ;;  %v104_v41 = vadd.s32 128, %v103_v39  ;;  %vm153_vm9 = vcmp.ge.s32.totalorder %v365_v15, 0  ;;  %vm155_vm11 = vcmp.ge.s32.totalorder %v360_v14, 0  ;;  %p286_p10 = pnand %p284_p9, %p281_p8 }
  0x18   :  { %vm156_vm12 = vcmp.ge.s32.totalorder %v372_v16, 0 }
  0x1a   :  { %46 = vmax.xlane.f32.xlu0 %v45_v11 }
  0x1b   :  { %52 = vmax.xlane.f32.xlu1 %v51_v12  ;;  %v186_v12 = vsel %vm156_vm12, 1.0, %v298_v4 }
  0x2c   :  { %113 = vperm.xlu1 %233, %v354_v13  }
  0x30   :  { %116 = vperm.xlu1 %233, %v360_v14   ;;  %110 = vperm.xlu0 %232, %v365_v15  }
  0x34   :  { %119 = vperm.xlu1 %233, %v372_v16  }
  0xa3   :  { %v375_v17 = vpop.xlane.xlu0 %43 }
  0xa4   :  { %v54_v18 = vsub.f32 %v327_v1, %v375_v17  ;;  %v55_v19 = vsub.f32 %v329_v2, %v375_v17  ;;  %v381_v20 = vpop.xlane.xlu1 %49 }
  0xa5   :  { %v58_v21 = vsub.f32 %v331_v3, %v381_v20  ;;  %v59_v22 = vsub.f32 %v335_v5, %v381_v20 }
  0xa6   :  { %v62_v23 = vmul.f32 1.442695, %v54_v18  ;;  %v64_v24 = vmul.f32 1.442695, %v55_v19  ;;  %v192_v19 = vsel %vm162_vm10, %v186_v12, 0.0 }
  0xa7   :  { %v70_v25 = vmul.f32 1.442695, %v58_v21  ;;  %v72_v26 = vmul.f32 1.442695, %v59_v22  ;;  %v387_v27 = vpop.xlane.xlu0 %46 }
  0xa8   :  { %234 = vpow2.f32 %v62_v23  ;;  %v56_v28 = vsub.f32 %v337_v6, %v387_v27  ;;  %v57_v29 = vsub.f32 %v339_v7, %v387_v27  ;;  %v393_v30 = vpop.xlane.xlu1 %52 }
  0xa9   :  { %236 = vpow2.f32 %v64_v24  ;;  %v60_v31 = vsub.f32 %v343_v9, %v393_v30  ;;  %v61_v32 = vsub.f32 %v345_v10, %v393_v30 }
  0xaa   :  { %238 = vpow2.f32 %v70_v25  ;;  %v66_v33 = vmul.f32 1.442695, %v56_v28  ;;  %v68_v34 = vmul.f32 1.442695, %v57_v29 }
  0xab   :  { %240 = vpow2.f32 %v72_v26  ;;  %v74_v36 = vmul.f32 1.442695, %v60_v31  ;;  %v76_v37 = vmul.f32 1.442695, %v61_v32 }
  0xac   :  { %242 = vpow2.f32 %v66_v33  ;;  %v114_v38 = vpop.permute.xlu1 %113 }
  0xad   :  { %244 = vpow2.f32 %v68_v34  ;;  %vm123_vm4 = vcmp.eq.s32.totalorder %v103_v39, %v114_v38  ;;  %vm124_vm5 = vcmp.eq.s32.totalorder %v104_v41, %v114_v38 }
  0xae   :  { %246 = vpow2.f32 %v74_v36  ;;  %v131_v62 = vsel %vm123_vm4, %v337_v6, 0.0  ;;  %v132_v63 = vsel %vm124_vm5, %v339_v7, 0.0  ;;  %v183_v6 = vsel %vm153_vm9, 1.0, %v298_v4 }
  0xaf   :  { %248 = vpow2.f32 %v76_v37  ;;  %v111_v47 = vpop.permute.xlu0 %110  ;;  %v140_v0 = vadd.f32 %v132_v63, %v131_v62  ;;  %v187_v8 = vsel %vm162_vm10, %v183_v6, 0.0 }
  0xb0   :  { %v117_v43 = vpop.permute.xlu1 %116  ;;  %vm121_vm2 = vcmp.eq.s32.totalorder %v103_v39, %v111_v47  ;;  %vm122_vm3 = vcmp.eq.s32.totalorder %v104_v41, %v111_v47 }
  0xb1   :  { %vm125_vm0 = vcmp.eq.s32.totalorder %v103_v39, %v117_v43  ;;  %vm126_vm1 = vcmp.eq.s32.totalorder %v104_v41, %v117_v43  ;;  %v129_v58 = vsel %vm121_vm2, %v327_v1, 0.0  ;;  %v130_v59 = vsel %vm122_vm3, %v329_v2, 0.0 }
  0xb2   :  { %v235_v40 = vpop.eup %234  ;;  %v133_v51 = vsel %vm125_vm0, %v331_v3, 0.0  ;;  %v134_v52 = vsel %vm126_vm1, %v335_v5, 0.0  ;;  %v137_v60 = vadd.f32 %v130_v59, %v129_v58  ;;  %v184_v5 = vsel %vm154_vm8, 1.0, %v298_v4 }
  0xb3   :  { %v237_v42 = vpop.eup %236  ;;  %v143_v57 = vadd.f32 %v134_v52, %v133_v51  ;;  %v188_v7 = vsel %vm162_vm10, %v184_v5, 0.0 }
  0xb4   :  { %v239_v44 = vpop.eup %238  ;;  %v78_v45 = vadd.f32 %v237_v42, %v235_v40  ;;  %v120_v61 = vpop.permute.xlu1 %119 }
  0xb5   :  { %v241_v46 = vpop.eup %240  ;;  %vm127_vm6 = vcmp.eq.s32.totalorder %v103_v39, %v120_v61  ;;  %vm128_vm7 = vcmp.eq.s32.totalorder %v104_v41, %v120_v61 }
  0xb6   :  { %v243_v48 = vpop.eup %242  ;;  %79 = vadd.xlane.f32.xlu1 %v78_v45  ;;  %v84_v49 = vadd.f32 %v241_v46, %v239_v44  ;;  %v135_v3 = vsel %vm127_vm6, %v343_v9, 0.0  ;;  %v136_v1 = vsel %vm128_vm7, %v345_v10, 0.0  ;;  %v185_v9 = vsel %vm155_vm11, 1.0, %v298_v4 }
  0xb7   :  { %v245_v50 = vpop.eup %244  ;;  %v146_v2 = vadd.f32 %v136_v1, %v135_v3  ;;  %v189_v10 = vadd.f32 %v188_v7, %v187_v8  ;;  %v190_v11 = vsel %vm162_vm10, %v185_v9, 0.0 }
  0xb8   :  { %v247_v53 = vpop.eup %246  ;;  %v81_v54 = vadd.f32 %v245_v50, %v243_v48 }
  0xb9   :  { %v249_v55 = vpop.eup %248  ;;  %v191_v18 = vadd.f32 %v190_v11, %v189_v10 }
  0xba   :  { %85 = vadd.xlane.f32.xlu1 %v84_v49  ;;  %82 = vadd.xlane.f32.xlu0 %v81_v54  ;;  %v87_v56 = vadd.f32 %v249_v55, %v247_v53 }
  0xbb   :  { %v193_v21 = vadd.f32 %v192_v19, %v191_v18 }
  0xbe   :  { %88 = vadd.xlane.f32.xlu1 %v87_v56  ;;  %144 = vadd.xlane.f32.xlu0 %v143_v57 }
  0xc2   :  { %138 = vadd.xlane.f32.xlu1 %v137_v60 }
  0xc6   :  { %141 = vadd.xlane.f32.xlu1 %v140_v0 }
  0xca   :  { %147 = vadd.xlane.f32.xlu1 %v146_v2 }
  0xce   :  { %194 = vadd.xlane.f32.xlu1 %v193_v21 }
 0x143   :  { %v80_v22 = vpop.xlane.xlu1 %79 }
 0x144   :  { %250 = vlog2.f32 %v80_v22 }
 0x147   :  { %v86_v23 = vpop.xlane.xlu1 %85  ;;  %v83_v24 = vpop.xlane.xlu0 %82 }
 0x148   :  { %252 = vlog2.f32 %v86_v23 }
 0x149   :  { %254 = vlog2.f32 %v83_v24 }
 0x14b   :  { %v89_v25 = vpop.xlane.xlu1 %88  ;;  %v145_v40 = vpop.xlane.xlu0 %144 }
 0x14c   :  { %256 = vlog2.f32 %v89_v25 }
 0x14e   :  { %v251_v26 = vpop.eup %250 }
 0x14f   :  { %v91_v28 = vmul.f32 0.6931472, %v251_v26  ;;  %v139_v29 = vpop.xlane.xlu1 %138 }
 0x151   :  { %v98_v31 = vadd.f32 %v91_v28, %v375_v17 }
 0x152   :  { %v253_v32 = vpop.eup %252 }
 0x153   :  { %v255_v33 = vpop.eup %254  ;;  %v95_v34 = vmul.f32 0.6931472, %v253_v32  ;;  %v149_v36 = vsub.f32 %v98_v31, %v139_v29  ;;  %v142_v37 = vpop.xlane.xlu1 %141 }
 0x154   :  { %v93_v35 = vmul.f32 0.6931472, %v255_v33 }
 0x155   :  { %v100_v38 = vadd.f32 %v95_v34, %v381_v20  ;;  %v158_v44 = vsel %vm153_vm9, %v149_v36, 0.0 }
 0x156   :  { %v257_v39 = vpop.eup %256  ;;  %v99_v41 = vadd.f32 %v93_v35, %v387_v27  ;;  %v163_v20 = vsel %vm162_vm10, %v158_v44, 0.0 }
 0x157   :  { %v97_v42 = vmul.f32 0.6931472, %v257_v39  ;;  %v151_v43 = vsub.f32 %v100_v38, %v145_v40  ;;  %v148_v48 = vpop.xlane.xlu1 %147 }
 0x158   :  { %v150_v45 = vsub.f32 %v99_v41, %v142_v37 }
 0x159   :  { %v101_v17 = vadd.f32 %v97_v42, %v393_v30  ;;  %v160_v46 = vsel %vm155_vm11, %v151_v43, 0.0 }
 0x15a   :  { %v159_v47 = vsel %vm154_vm8, %v150_v45, 0.0  ;;  %v166_v51 = vsel %vm162_vm10, %v160_v46, 0.0 }
 0x15b   :  { %v164_v49 = vsel %vm162_vm10, %v159_v47, 0.0  ;;  %v152_v27 = vsub.f32 %v101_v17, %v148_v48  ;;  %v195_v53 = vpop.xlane.xlu1 %194 }
 0x15c   :  { %v165_v50 = vadd.f32 %v164_v49, %v163_v20  ;;  %v196_v13 = vrot.slane %v195_v53, 4 }
 0x15d   :  { %v161_v15 = vsel %vm156_vm12, %v152_v27, 0.0 }
 0x15e   :  { %v167_v52 = vadd.f32 %v166_v51, %v165_v50  ;;  %v168_v30 = vsel %vm162_vm10, %v161_v15, 0.0  ;;  %v197_v54 = vadd.f32 %v196_v13, %v195_v53 }
 0x160   :  { %v169_v14 = vadd.f32 %v168_v30, %v167_v52  ;;  %v198_v55 = vrot.slane %v197_v54, 2 }
 0x162   :  { %170 = vadd.xlane.f32.xlu0 %v169_v14  ;;  %v199_v59 = vadd.f32 %v198_v55, %v197_v54 }
 0x164   :  { %v200_v62 = vrot.slane %v199_v59, 1 }
 0x166   :  { %v201_v16 = vadd.f32 %v200_v62, %v199_v59 }
 0x1ef   :  { %v171_v56 = vpop.xlane.xlu0 %170 }
 0x1f0   :  { %v172_v57 = vrot.slane %v171_v56, 4 }
 0x1f2   :  { %v173_v58 = vadd.f32 %v172_v57, %v171_v56 }
 0x1f4   :  { %v174_v60 = vrot.slane %v173_v58, 2 }
 0x1f6   :  { %v175_v61 = vadd.f32 %v174_v60, %v173_v58 }
 0x1f8   :  { %v176_v63 = vrot.slane %v175_v61, 1 }
 0x1fa   :  { %v177_v0 = vadd.f32 %v176_v63, %v175_v61 }
 0x1fc   :  { %221 = vpush %v177_v0 }
 0x1fd   :  { %223 = vpush %v201_v16 }
 0x22d   :  { %s222_s1 = spop %221 }
 0x22e   :  { %s224_s30 = spop %223  ;;  %181 = sst [smem:[#allocation5]] %s222_s1 }
 0x22f   :  { %205 = sst [smem:[#allocation5 + $0x1]] %s224_s30 }
 0x230   :  { %289 = shalt.err (!%p286_p10)
}
 0x231   :  { %s299_s10 = smov [#allocation5]  }
 0x232   :  { %213 = dma.smem_to_hbm %s299_s10, 16, %s453_s2, [#allocation4]  }
 0x233   :  { %292 = dma.done.wait [#allocation4], 16  }
 0x234   :  { %293 = vsyncadd [#allocation4], 4294967280 }
 0x235   :  { %217 = sfence }
 0x236   :  { %218 = vsyncpa [#allocation3], 1 }
 0x237   :  { %219 = vsyncpa [#allocation4], 1 }

</bundles_post_ra>
